<compile_context>
chip_gen: v7x
topology: tpu7x:2x2x1
jax: 0.10.0
libtpu: 0.0.40
codegen_flags: <defaults>
</compile_context>

<pallas_src>
import functools

import jax
import jax.numpy as jnp
from jax.experimental import pallas as pl
from jax.experimental.pallas import tpu as pltpu

MODEL_DIM = 32
FFN_RATIO = 4
LN_EPS = 1e-5


def ffn_kernel(xp_ref, m_ref, wv_ref, bc_ref, w_out_ref, b_out_ref, o_ref, *,
               ew_dtype):
    """One (tm, P*D) lane-packed row tile: P tokens per 128-lane row."""
    x = xp_ref[...].astype(jnp.float32)                          # (tm, P*D)

    # --- per-token LayerNorm on the packed layout (centered, two-pass) ---
    # m = block_diag(ones(D,D)/D, ... P times): broadcasts each token's segment
    # mean across its own D lanes.  bf16 MXU inputs, f32 accumulation (1/D is
    # exact in bf16 for D=32) -- avoids the multi-pass f32 MXU decomposition.
    m = m_ref[...]
    mean = jnp.dot(x.astype(jnp.bfloat16), m, preferred_element_type=jnp.float32)
    centered = x - mean
    var = jnp.dot((centered * centered).astype(jnp.bfloat16), m,
                  preferred_element_type=jnp.float32)
    xn = centered * jax.lax.rsqrt(var + LN_EPS)   # gamma/beta folded into weights

    # --- fused SwiGLU gate+value projection: one MXU weight push for both ---
    hwv = jnp.dot(xn.astype(jnp.bfloat16), wv_ref[...],
                  preferred_element_type=jnp.float32) + bc_ref[...]  # (tm, 2*P*H)
    HP = hwv.shape[-1] // 2
    hw = hwv[:, :HP].astype(ew_dtype)             # lane-aligned (multiple-of-128) split
    hv = hwv[:, HP:].astype(ew_dtype)
    h = (hw * jax.nn.sigmoid(hw)) * hv            # f32 on v5e, bf16 on v6e/v7x

    # --- output projection + residual (residual stays exact f32) ---
    y = jnp.dot(h.astype(jnp.bfloat16), w_out_ref[...],
                preferred_element_type=jnp.float32) + b_out_ref[...]  # (tm, P*D)
    o_ref[...] = (x + y).astype(o_ref.dtype)      # lane-dense store


def _packed_params(params, pack):
    """Block-diagonal / lane-tiled parameter copies for the packed layout.

    Constant-folded under jit.  LayerNorm affine is folded into the fused
    projection: (xhat*g + b) @ W + bias == xhat @ (diag(g) @ W) + (b @ W + bias).
    Matmul weights cast to bf16 (MXU-native); biases stay f32.
    """
    D, H = params["w_in"].shape
    eye = jnp.eye(pack, dtype=jnp.float32)
    gamma = params["gamma"].reshape(D)
    beta = params["beta"].reshape(D)

    w_in = gamma[:, None] * params["w_in"]
    v_in = gamma[:, None] * params["v_in"]
    b_in = params["b_in"].reshape(H) + beta @ params["w_in"]
    c_in = params["c_in"].reshape(H) + beta @ params["v_in"]

    wv = jnp.concatenate([jnp.kron(eye, w_in), jnp.kron(eye, v_in)],
                         axis=1).astype(jnp.bfloat16)            # (P*D, 2*P*H)
    bc = jnp.concatenate([jnp.tile(b_in, pack), jnp.tile(c_in, pack)])[None, :]

    return dict(
        m=jnp.kron(eye, jnp.full((D, D), 1.0 / D, jnp.float32)).astype(jnp.bfloat16),
        wv_in=wv,
        bc_in=bc.astype(jnp.float32),                            # (1, 2*P*H)
        w_out=jnp.kron(eye, params["w_out"]).astype(jnp.bfloat16),  # (P*H, P*D)
        b_out=jnp.tile(params["b_out"], (1, pack)).astype(jnp.float32),
    )


def _gen_defaults():
    """Generation-specific defaults: tile rows, elementwise dtype, VMEM limit."""
    try:
        kind = jax.devices()[0].device_kind.lower()
    except Exception:  # pragma: no cover - defensive
        kind = ""
    if "v5" in kind:
        # v5e: no bf16 VPU/EUP, 16 MiB default scoped VMEM (128 MiB physical).
        return dict(tm=1024, ew_dtype=jnp.float32, vmem_limit=64 << 20)
    if "v7" in kind or "tpu7" in kind:
        # v7x: 64 MiB physical VMEM, 2 TensorCores, HBM 3.2 TB/s.
        return dict(tm=2048, ew_dtype=jnp.bfloat16, vmem_limit=48 << 20)
    # v6e and default.
    return dict(tm=2048, ew_dtype=jnp.bfloat16, vmem_limit=64 << 20)


def ffn_layer(x, params, *, tm=None, ew_dtype=None, vmem_limit_bytes=None):
    """x: (batch, seq, model_dim) float32 -> same shape/dtype."""
    defaults = _gen_defaults()
    tm = defaults["tm"] if tm is None else tm
    ew_dtype = defaults["ew_dtype"] if ew_dtype is None else ew_dtype
    vmem_limit_bytes = (defaults["vmem_limit"] if vmem_limit_bytes is None
                        else vmem_limit_bytes)

    B, S, D = x.shape
    H = params["w_in"].shape[1]
    N = B * S

    # Lane-packing factor: P tokens per 128-lane row.
    P = 128 // D if (D <= 128 and 128 % D == 0) else 1
    DP, HP = P * D, P * H

    x2 = x.reshape(N, D)
    tok_pad = (-N) % P
    if tok_pad:
        # TODO(synk): ragged pack tail copies the activations once; at realistic
        # shapes keep batch*seq a multiple of the pack factor to skip this pad.
        x2 = jnp.pad(x2, ((0, tok_pad), (0, 0)))
    Npk = x2.shape[0] // P
    xp = x2.reshape(Npk, DP)                    # row-major => pure relayout

    # Row-tile size: multiple of 8 sublanes (or full array if tiny).  NO row
    # padding: grid uses cdiv and Pallas masks the edge block's stores.  Rows are
    # independent, so garbage in the OOB-read part of the edge tile is inert.
    if Npk < 8:
        tm = Npk
    else:
        tm = max(8, (min(tm, Npk) // 8) * 8)
        if Npk >= 16:
            # Guarantee >= 2 grid steps so v7x's second TensorCore is not idle.
            tm = min(tm, max(8, ((Npk // 2) // 8) * 8))
    grid = (pl.cdiv(Npk, tm),)

    pp = _packed_params(params, P)

    row_spec = pl.BlockSpec((tm, DP), lambda i: (i, 0))
    full = lambda a: pl.BlockSpec(a.shape, lambda i: (0, 0))    # resident params

    cost = pl.CostEstimate(
        flops=int(Npk * (2 * DP * DP * 2 + 2 * DP * (2 * HP) + 2 * HP * DP)),
        transcendentals=int(N * H + Npk * DP),                  # sigmoid + rsqrt
        bytes_accessed=int(2 * Npk * DP * 4
                           + (DP * DP + DP * 2 * HP + HP * DP) * 2
                           + (2 * HP + DP) * 4),
    )

    kernel = functools.partial(ffn_kernel, ew_dtype=ew_dtype)

    out = pl.pallas_call(
        kernel,
        out_shape=jax.ShapeDtypeStruct((Npk, DP), x.dtype),
        grid_spec=pltpu.PrefetchScalarGridSpec(
            num_scalar_prefetch=0,
            grid=grid,
            in_specs=[
                row_spec,                     # packed activation rows
                full(pp["m"]),                # (DP, DP) segment-mean matrix, bf16
                full(pp["wv_in"]), full(pp["bc_in"]),
                full(pp["w_out"]), full(pp["b_out"]),
            ],
            out_specs=row_spec,
        ),
        compiler_params=pltpu.CompilerParams(
            # Row tiles are independent -> shards across v7x's 2 TensorCores.
            dimension_semantics=("parallel",),
            vmem_limit_bytes=vmem_limit_bytes,
        ),
        cost_estimate=cost,
    )(xp, pp["m"], pp["wv_in"], pp["bc_in"], pp["w_out"], pp["b_out"])

    out = out.reshape(Npk * P, D)[:N]
    return out.reshape(B, S, D)


def init_params(key, model_dim=MODEL_DIM, ffn_ratio=FFN_RATIO):
    H = ffn_ratio * model_dim
    k1, k2, k3 = jax.random.split(key, 3)
    return {
        # LayerNorm: weight=1, bias=0 (PyTorch default).
        "gamma": jnp.ones((1, model_dim), jnp.float32),
        "beta": jnp.zeros((1, model_dim), jnp.float32),
        # Linear weights ~ N(0, 0.02), biases zero (matches _init_weights).
        # Stored as (in, out) so the kernel does x @ W directly.
        "w_in": 0.02 * jax.random.normal(k1, (model_dim, H), jnp.float32),
        "b_in": jnp.zeros((1, H), jnp.float32),
        "v_in": 0.02 * jax.random.normal(k2, (model_dim, H), jnp.float32),
        "c_in": jnp.zeros((1, H), jnp.float32),
        "w_out": 0.02 * jax.random.normal(k3, (H, model_dim), jnp.float32),
        "b_out": jnp.zeros((1, model_dim), jnp.float32),
    }


def ffn_ref(x, p):
    """Pure-f32 JAX reference for correctness checks."""
    mean = jnp.mean(x, axis=-1, keepdims=True)
    var = jnp.mean((x - mean) ** 2, axis=-1, keepdims=True)
    xn = (x - mean) * jax.lax.rsqrt(var + LN_EPS)
    xn = xn * p["gamma"][0] + p["beta"][0]
    hw = xn @ p["w_in"] + p["b_in"][0]
    hv = xn @ p["v_in"] + p["c_in"][0]
    h = (hw * jax.nn.sigmoid(hw)) * hv
    return x + (h @ p["w_out"] + p["b_out"][0])


if __name__ == "__main__":
    key = jax.random.PRNGKey(0)
    kx, kx2, kp, kg, kb = jax.random.split(key, 5)
    params = init_params(kp)

    # Canonical small shape (single grid step, no padding paths).
    B, S, D = 2, 8, MODEL_DIM
    x = jax.random.normal(kx, (B, S, D), jnp.float32)
    out = jax.block_until_ready(ffn_layer(x, params))
    ref = ffn_ref(x, params)
    assert out.shape == (B, S, D)
    # bf16 MXU inputs (f32 accumulation) => relaxed tolerance vs pure-f32 ref.
    assert jnp.allclose(out, ref, atol=2e-3, rtol=2e-3), "mismatch vs reference"

    # Ragged shape with non-trivial LayerNorm affine: exercises the token-pack
    # pad, grid > 1, the masked edge block, and the gamma/beta weight folding.
    params2 = dict(params,
                   gamma=1.0 + 0.1 * jax.random.normal(kg, (1, D), jnp.float32),
                   beta=0.1 * jax.random.normal(kb, (1, D), jnp.float32))
    B2, S2 = 3, 37
    x2 = jax.random.normal(kx2, (B2, S2, D), jnp.float32)
    out2 = jax.block_until_ready(ffn_layer(x2, params2))
    ref2 = ffn_ref(x2, params2)
    assert out2.shape == (B2, S2, D)
    assert jnp.allclose(out2, ref2, atol=2e-3, rtol=2e-3), "mismatch (ragged case)"

    print("KERNEL_OK")
</pallas_src>

<mosaic_0001>
module attributes {stable_mosaic.version = 11 : i64} {
  func.func @ffn_kernel(%arg0: i32, %arg1: memref<4x128xf32, #tpu.memory_space<vmem>>, %arg2: memref<128x128xbf16, #tpu.memory_space<vmem>>, %arg3: memref<128x1024xbf16, #tpu.memory_space<vmem>>, %arg4: memref<1x1024xf32, #tpu.memory_space<vmem>>, %arg5: memref<512x128xbf16, #tpu.memory_space<vmem>>, %arg6: memref<1x128xf32, #tpu.memory_space<vmem>>, %arg7: memref<4x128xf32, #tpu.memory_space<vmem>>) attributes {dimension_semantics = [#tpu.dimension_semantics<parallel>], iteration_bounds = array<i64: 1>, scalar_prefetch = 0 : i64, scratch_operands = 0 : i64, tpu.core_type = #tpu.core_type<tc>, window_params = [{transform_indices = @transform_0, window_bounds = array<i64: 4, 128>}, {pipeline_mode = #tpu.pipeline_mode<synchronous>, transform_indices = @transform_1, window_bounds = array<i64: 128, 128>}, {pipeline_mode = #tpu.pipeline_mode<synchronous>, transform_indices = @transform_2, window_bounds = array<i64: 128, 1024>}, {pipeline_mode = #tpu.pipeline_mode<synchronous>, transform_indices = @transform_3, window_bounds = array<i64: 1, 1024>}, {pipeline_mode = #tpu.pipeline_mode<synchronous>, transform_indices = @transform_4, window_bounds = array<i64: 512, 128>}, {pipeline_mode = #tpu.pipeline_mode<synchronous>, transform_indices = @transform_5, window_bounds = array<i64: 1, 128>}, {transform_indices = @transform_6, window_bounds = array<i64: 4, 128>}]} {
    %c0 = arith.constant 0 : index
    %c0_0 = arith.constant 0 : index
    %0 = vector.load %arg1[%c0, %c0_0] : memref<4x128xf32, #tpu.memory_space<vmem>>, vector<4x128xf32>
    %c0_1 = arith.constant 0 : index
    %c0_2 = arith.constant 0 : index
    %1 = vector.load %arg2[%c0_1, %c0_2] : memref<128x128xbf16, #tpu.memory_space<vmem>>, vector<128x128xbf16>
    %2 = arith.truncf %0 : vector<4x128xf32> to vector<4x128xbf16>
    %cst = arith.constant dense<0.000000e+00> : vector<4x128xf32>
    %3 = tpu.matmul %2, %1, %cst {dimension_numbers = #tpu.dot_dimension_numbers<[1], [0], [0], [1], [0, 0, 1, 1], [], []>} : vector<4x128xbf16>, vector<128x128xbf16>, vector<4x128xf32> -> vector<4x128xf32>
    %4 = arith.subf %0, %3 : vector<4x128xf32>
    %5 = arith.mulf %4, %4 : vector<4x128xf32>
    %6 = arith.truncf %5 : vector<4x128xf32> to vector<4x128xbf16>
    %cst_3 = arith.constant dense<0.000000e+00> : vector<4x128xf32>
    %7 = tpu.matmul %6, %1, %cst_3 {dimension_numbers = #tpu.dot_dimension_numbers<[1], [0], [0], [1], [0, 0, 1, 1], [], []>} : vector<4x128xbf16>, vector<128x128xbf16>, vector<4x128xf32> -> vector<4x128xf32>
    %cst_4 = arith.constant 9.99999974E-6 : f32
    %8 = vector.broadcast %cst_4 : f32 to vector<4x128xf32>
    %9 = arith.addf %7, %8 : vector<4x128xf32>
    %10 = math.rsqrt %9 : vector<4x128xf32>
    %11 = arith.mulf %4, %10 : vector<4x128xf32>
    %12 = arith.truncf %11 : vector<4x128xf32> to vector<4x128xbf16>
    %c0_5 = arith.constant 0 : index
    %c0_6 = arith.constant 0 : index
    %13 = vector.load %arg3[%c0_5, %c0_6] : memref<128x1024xbf16, #tpu.memory_space<vmem>>, vector<128x1024xbf16>
    %cst_7 = arith.constant dense<0.000000e+00> : vector<4x1024xf32>
    %14 = tpu.matmul %12, %13, %cst_7 {dimension_numbers = #tpu.dot_dimension_numbers<[1], [0], [0], [1], [0, 0, 1, 1], [], []>} : vector<4x128xbf16>, vector<128x1024xbf16>, vector<4x1024xf32> -> vector<4x1024xf32>
    %c0_8 = arith.constant 0 : index
    %c0_9 = arith.constant 0 : index
    %15 = vector.load %arg4[%c0_8, %c0_9] : memref<1x1024xf32, #tpu.memory_space<vmem>>, vector<1x1024xf32>
    %16 = vector.broadcast %15 : vector<1x1024xf32> to vector<4x1024xf32>
    %17 = arith.addf %14, %16 : vector<4x1024xf32>
    %18 = vector.extract_strided_slice %17 {offsets = [0, 0], sizes = [4, 512], strides = [1, 1]} : vector<4x1024xf32> to vector<4x512xf32>
    %19 = arith.truncf %18 : vector<4x512xf32> to vector<4x512xbf16>
    %20 = vector.extract_strided_slice %17 {offsets = [0, 512], sizes = [4, 512], strides = [1, 1]} : vector<4x1024xf32> to vector<4x512xf32>
    %21 = arith.truncf %20 : vector<4x512xf32> to vector<4x512xbf16>
    %22 = arith.negf %19 : vector<4x512xbf16>
    %23 = math.exp %22 : vector<4x512xbf16>
    %cst_10 = arith.constant 1.000000e+00 : bf16
    %24 = vector.broadcast %cst_10 : bf16 to vector<4x512xbf16>
    %25 = arith.addf %24, %23 : vector<4x512xbf16>
    %26 = arith.divf %24, %25 : vector<4x512xbf16>
    %27 = arith.mulf %19, %26 : vector<4x512xbf16>
    %28 = arith.mulf %27, %21 : vector<4x512xbf16>
    %c0_11 = arith.constant 0 : index
    %c0_12 = arith.constant 0 : index
    %29 = vector.load %arg5[%c0_11, %c0_12] : memref<512x128xbf16, #tpu.memory_space<vmem>>, vector<512x128xbf16>
    %cst_13 = arith.constant dense<0.000000e+00> : vector<4x128xf32>
    %30 = tpu.matmul %28, %29, %cst_13 {dimension_numbers = #tpu.dot_dimension_numbers<[1], [0], [0], [1], [0, 0, 1, 1], [], []>} : vector<4x512xbf16>, vector<512x128xbf16>, vector<4x128xf32> -> vector<4x128xf32>
    %c0_14 = arith.constant 0 : index
    %c0_15 = arith.constant 0 : index
    %31 = vector.load %arg6[%c0_14, %c0_15] : memref<1x128xf32, #tpu.memory_space<vmem>>, vector<1x128xf32>
    %32 = vector.broadcast %31 : vector<1x128xf32> to vector<4x128xf32>
    %33 = arith.addf %30, %32 : vector<4x128xf32>
    %34 = arith.addf %0, %33 : vector<4x128xf32>
    %c0_16 = arith.constant 0 : index
    %c0_17 = arith.constant 0 : index
    %35 = vector.load %arg7[%c0_16, %c0_17] : memref<4x128xf32, #tpu.memory_space<vmem>>, vector<4x128xf32>
    tpu.vector_store %arg7[%c0_16, %c0_17], %34 {strides = array<i32>} : memref<4x128xf32, #tpu.memory_space<vmem>>, vector<4x128xf32>,
    return
  }
  func.func @transform_0(%arg0: i32) -> (i32, i32) {
    %c0_i32 = arith.constant 0 : i32
    %c0_i32_0 = arith.constant 0 : i32
    return %arg0, %c0_i32 : i32, i32
  }
  func.func @transform_1(%arg0: i32) -> (i32, i32) {
    %c0_i32 = arith.constant 0 : i32
    %c0_i32_0 = arith.constant 0 : i32
    %c0_i32_1 = arith.constant 0 : i32
    return %c0_i32, %c0_i32_0 : i32, i32
  }
  func.func @transform_2(%arg0: i32) -> (i32, i32) {
    %c0_i32 = arith.constant 0 : i32
    %c0_i32_0 = arith.constant 0 : i32
    %c0_i32_1 = arith.constant 0 : i32
    return %c0_i32, %c0_i32_0 : i32, i32
  }
  func.func @transform_3(%arg0: i32) -> (i32, i32) {
    %c0_i32 = arith.constant 0 : i32
    %c0_i32_0 = arith.constant 0 : i32
    %c0_i32_1 = arith.constant 0 : i32
    return %c0_i32, %c0_i32_0 : i32, i32
  }
  func.func @transform_4(%arg0: i32) -> (i32, i32) {
    %c0_i32 = arith.constant 0 : i32
    %c0_i32_0 = arith.constant 0 : i32
    %c0_i32_1 = arith.constant 0 : i32
    return %c0_i32, %c0_i32_0 : i32, i32
  }
  func.func @transform_5(%arg0: i32) -> (i32, i32) {
    %c0_i32 = arith.constant 0 : i32
    %c0_i32_0 = arith.constant 0 : i32
    %c0_i32_1 = arith.constant 0 : i32
    return %c0_i32, %c0_i32_0 : i32, i32
  }
  func.func @transform_6(%arg0: i32) -> (i32, i32) {
    %c0_i32 = arith.constant 0 : i32
    %c0_i32_0 = arith.constant 0 : i32
    return %arg0, %c0_i32 : i32, i32
  }
}

</mosaic_0001>

<bundles_post_ra>
// kernel: tpu_custom_call.1
= control target key start
LH: loop header
LB: loop body
LE: loop exit
PB: predicated region body
PF: predicated region fallthrough
CT: control target
= control target key end

     0   :  { %11 = vsyncpa [#allocation3], 0  ;;  %s1858_s0 = inlined_call_operand.hbm [shape: f32[4,128], index: 0, kind: input, shape index: {}]   ;;  %s1859_s1 = inlined_call_operand.hbm [shape: bf16[128,128], index: 1, kind: input, shape index: {}]   ;;  %s1860_s2 = inlined_call_operand.hbm [shape: bf16[128,1024], index: 2, kind: input, shape index: {}]   ;;  %s1861_s3 = inlined_call_operand.hbm [shape: f32[1,1024], index: 3, kind: input, shape index: {}]   ;;  %s1862_s4 = inlined_call_operand.hbm [shape: bf16[512,128], index: 4, kind: input, shape index: {}]   ;;  %s1863_s5 = inlined_call_operand.hbm [shape: f32[1,128], index: 5, kind: input, shape index: {}]   ;;  %s1864_s6 = inlined_call_operand.hbm [shape: f32[4,128], index: 6, kind: output, shape index: {}]  }
   0x1   :  { %12 = vsyncpa [#allocation6], 0 }
   0x2   :  { %13 = vsyncpa [#allocation9], 0 }
   0x3   :  { %14 = vsyncpa [#allocation12], 0 }
   0x4   :  { %15 = vsyncpa [#allocation4], 0  ;;  %s1698_s21 = smov [#allocation5]   ;;  %s1534_s25 = scalar_lea.hbm %s1859_s1, 1024 }
   0x5   :  { %s31_s22 = sshll.u32 %s1698_s21, 4  ;;  %p1535_p0 = scmp.ne.s32.totalorder %s1859_s1, %s1534_s25  ;;  %s32_s22 = int_to_ptr.vmem [resolvable:$true] %s31_s22 }
   0x6   :  { %p1538_p1 = scmp.lt.u32.totalorder %s1534_s25, %s1859_s1 }
   0x8   :  { %p1540_p2 = pnand %p1538_p1, %p1535_p0 }
   0xa   :  { %1543 = shalt.err (!%p1540_p2)
}
   0xb   :  { %s1544_s30 = scalar_lea.vmem %s32_s22, 1024  ;;  %p1549_p4 = scmp.lt.s32.totalorder %s32_s22, %s32_s22 }
   0xc   :  { %p1545_p3 = scmp.ne.s32.totalorder %s32_s22, %s1544_s30  ;;  %p1550_p5 = scmp.lt.s32.totalorder %s1544_s30, %s1544_s30 }
   0xe   :  { %p1551_p6 = por %p1550_p5, %p1549_p4 }
  0x10   :  { %p1552_p7 = pnand %p1551_p6, %p1545_p3 }
  0x12   :  { %1555 = shalt.err (!%p1552_p7)
}
  0x13   :  { %s1699_s7 = smov 64   ;;  %s1700_s8 = smov 4  }
  0x14   :  { %37 = dma.hbm_to_vmem [thread:$0]  %s1859_s1, 1024, %s32_s22, [#allocation6], %s1699_s7, %s1699_s7, %s1700_s8  }
  0x15   :  { %s1701_s11 = smov [#allocation8]   ;;  %s1702_s13 = smov [#allocation2]  }
  0x16   :  { %s56_s12 = sshll.u32 %s1701_s11, 4  ;;  %s22_s14 = sshll.u32 %s1702_s13, 4  ;;  %s57_s12 = int_to_ptr.vmem [resolvable:$true] %s56_s12  ;;  %s23_s14 = int_to_ptr.vmem [resolvable:$true] %s22_s14 }
  0x17   :  { %s1556_s17 = scalar_lea.hbm %s1861_s3, 128 }
  0x18   :  { %p1557_p8 = scmp.ne.s32.totalorder %s1861_s3, %s1556_s17  ;;  %p1560_p9 = scmp.lt.u32.totalorder %s1556_s17, %s1861_s3 }
  0x1a   :  { %p1562_p10 = pnand %p1560_p9, %p1557_p8 }
  0x1c   :  { %1565 = shalt.err (!%p1562_p10)
}
  0x1d   :  { %s1566_s1 = scalar_lea.vmem %s57_s12, 128  ;;  %p1571_p12 = scmp.lt.s32.totalorder %s57_s12, %s57_s12 }
  0x1e   :  { %p1567_p11 = scmp.ne.s32.totalorder %s57_s12, %s1566_s1  ;;  %p1572_p13 = scmp.lt.s32.totalorder %s1566_s1, %s1566_s1 }
  0x20   :  { %p1573_p0 = por %p1572_p13, %p1571_p12 }
  0x22   :  { %p1574_p1 = pnand %p1573_p0, %p1567_p11 }
  0x24   :  { %1577 = shalt.err (!%p1574_p1)
}
  0x25   :  { %59 = dma.hbm_to_vmem [thread:$0]  %s1861_s3, 128, %s57_s12, [#allocation9]  }
  0x26   :  { %s1578_s26 = scalar_lea.hbm %s1858_s0, 64 }
  0x27   :  { %p1579_p2 = scmp.ne.s32.totalorder %s1858_s0, %s1578_s26  ;;  %p1582_p3 = scmp.lt.u32.totalorder %s1578_s26, %s1858_s0 }
  0x29   :  { %p1584_p4 = pnand %p1582_p3, %p1579_p2 }
  0x2b   :  { %1587 = shalt.err (!%p1584_p4)
}
  0x2c   :  { %s1588_s9 = scalar_lea.vmem %s23_s14, 64  ;;  %p1593_p6 = scmp.lt.s32.totalorder %s23_s14, %s23_s14 }
  0x2d   :  { %p1589_p5 = scmp.ne.s32.totalorder %s23_s14, %s1588_s9  ;;  %p1594_p7 = scmp.lt.s32.totalorder %s1588_s9, %s1588_s9 }
  0x2f   :  { %p1595_p8 = por %p1594_p7, %p1593_p6 }
  0x31   :  { %p1596_p9 = pnand %p1595_p8, %p1589_p5 }
  0x33   :  { %1599 = shalt.err (!%p1596_p9)
}
  0x34   :  { %25 = dma.hbm_to_vmem [thread:$0]  %s1858_s0, 64, %s23_s14, [#allocation3]  }
  0x35   :  { %s1703_s11 = smov [#allocation7]   ;;  %s1600_s16 = scalar_lea.hbm %s1860_s2, 8192 }
  0x36   :  { %s43_s12 = sshll.u32 %s1703_s11, 4  ;;  %p1601_p10 = scmp.ne.s32.totalorder %s1860_s2, %s1600_s16  ;;  %s44_s12 = int_to_ptr.vmem [resolvable:$true] %s43_s12 }
  0x37   :  { %p1604_p11 = scmp.lt.u32.totalorder %s1600_s16, %s1860_s2 }
  0x39   :  { %p1606_p12 = pnand %p1604_p11, %p1601_p10 }
  0x3b   :  { %1609 = shalt.err (!%p1606_p12)
}
  0x3c   :  { %s1610_s21 = scalar_lea.vmem %s44_s12, 8192  ;;  %p1615_p0 = scmp.lt.s32.totalorder %s44_s12, %s44_s12 }
  0x3d   :  { %p1611_p13 = scmp.ne.s32.totalorder %s44_s12, %s1610_s21  ;;  %p1616_p1 = scmp.lt.s32.totalorder %s1610_s21, %s1610_s21 }
  0x3f   :  { %p1617_p2 = por %p1616_p1, %p1615_p0 }
  0x41   :  { %p1618_p3 = pnand %p1617_p2, %p1611_p13 }
  0x43   :  { %1621 = shalt.err (!%p1618_p3)
}
  0x44   :  { %s1704_s0 = smov 512   ;;  %s1705_s14 = smov 32  }
  0x45   :  { %49 = dma.hbm_to_vmem [thread:$0]  %s1860_s2, 8192, %s44_s12, [#allocation6], %s1704_s0, %s1704_s0, %s1705_s14  }
  0x46   :  { %s1706_s23 = smov [#allocation10]   ;;  %s1707_s25 = smov [#allocation11]  }
  0x47   :  { %s65_s24 = sshll.u32 %s1706_s23, 4  ;;  %s78_s26 = sshll.u32 %s1707_s25, 4  ;;  %s66_s24 = int_to_ptr.vmem [resolvable:$true] %s65_s24  ;;  %s79_s26 = int_to_ptr.vmem [resolvable:$true] %s78_s26 }
  0x48   :  { %s1622_s29 = scalar_lea.hbm %s1862_s4, 4096 }
  0x49   :  { %p1623_p4 = scmp.ne.s32.totalorder %s1862_s4, %s1622_s29  ;;  %p1626_p5 = scmp.lt.u32.totalorder %s1622_s29, %s1862_s4 }
  0x4b   :  { %p1628_p6 = pnand %p1626_p5, %p1623_p4 }
  0x4d   :  { %1631 = shalt.err (!%p1628_p6)
}
  0x4e   :  { %s1632_s2 = scalar_lea.vmem %s66_s24, 4096  ;;  %p1637_p8 = scmp.lt.s32.totalorder %s66_s24, %s66_s24 }
  0x4f   :  { %p1633_p7 = scmp.ne.s32.totalorder %s66_s24, %s1632_s2  ;;  %p1638_p9 = scmp.lt.s32.totalorder %s1632_s2, %s1632_s2 }
  0x51   :  { %p1639_p10 = por %p1638_p9, %p1637_p8 }
  0x53   :  { %p1640_p11 = pnand %p1639_p10, %p1633_p7 }
  0x55   :  { %1643 = shalt.err (!%p1640_p11)
}
  0x56   :  { %71 = dma.hbm_to_vmem [thread:$0]  %s1862_s4, 4096, %s66_s24, [#allocation9], %s1699_s7, %s1699_s7, %s1700_s8  }
  0x57   :  { %s1644_s16 = scalar_lea.hbm %s1863_s5, 16 }
  0x58   :  { %p1645_p12 = scmp.ne.s32.totalorder %s1863_s5, %s1644_s16  ;;  %p1648_p13 = scmp.lt.u32.totalorder %s1644_s16, %s1863_s5 }
  0x5a   :  { %p1650_p0 = pnand %p1648_p13, %p1645_p12 }
  0x5c   :  { %1653 = shalt.err (!%p1650_p0)
}
  0x5d   :  { %s1654_s21 = scalar_lea.vmem %s79_s26, 16  ;;  %s1658_s0 = scalar_lea.vmem %s79_s26, 32 }
  0x5e   :  { %p1655_p1 = scmp.ne.s32.totalorder %s79_s26, %s1654_s21  ;;  %p1659_p2 = scmp.lt.s32.totalorder %s79_s26, %s79_s26 }
  0x5f   :  { %p1660_p3 = scmp.lt.s32.totalorder %s1658_s0, %s1654_s21 }
  0x61   :  { %p1661_p4 = por %p1660_p3, %p1659_p2 }
  0x63   :  { %p1662_p5 = pnand %p1661_p4, %p1655_p1 }
  0x65   :  { %1665 = shalt.err (!%p1662_p5)
}
  0x66   :  { %81 = dma.hbm_to_vmem [thread:$0]  %s1863_s5, 16, %s79_s26, [#allocation12]  }
  0x67   :  { %1688 = dma.done.wait [#allocation3], 64  }
  0x68   :  { %1689 = vsyncadd [#allocation3], 4294967232 }
  0x69   :  { %1690 = dma.done.wait [#allocation6], 9216  }
  0x6a   :  { %1691 = vsyncadd [#allocation6], 4294958080 }
  0x6b   :  { %1692 = dma.done.wait [#allocation9], 4224  }
  0x6c   :  { %1693 = vsyncadd [#allocation9], 4294963072 }
  0x6d   :  { %1694 = dma.done.wait [#allocation12], 16  }
  0x6e   :  { %1695 = vsyncadd [#allocation12], 4294967280  ;;  %v1708_v0 = vmov 0.0   ;;  %vm1709_vm0 = vmmov 0   ;;  %v1476_v1 = vld [vmem:[#allocation5] sm:$0xff]   ;;  %v1477_v2 = vld [vmem:[#allocation5 + $0x8] sm:$0xff]  }
  0x6f   :  { %1422 = vmatprep.subr.bf16.mxu0 %v1708_v0  ;;  %1438 = vmatprep.mubr.msk.bf16.mxu0 %vm1709_vm0, %v1708_v0  ;;  %v1478_v3 = vld [vmem:[#allocation5 + $0x10] sm:$0xff]   ;;  %v1479_v4 = vld [vmem:[#allocation5 + $0x18] sm:$0xff]   ;;  %v1480_v5 = vld [vmem:[#allocation5 + $0x20] sm:$0xff]   ;;  %s1711_s5 = smov [#allocation13]  }
  0x70   :  { %1442 = vmatprep.subr.bf16.mxu1 %v1708_v0  ;;  %1458 = vmatprep.mubr.msk.bf16.mxu1 %vm1709_vm0, %v1708_v0  ;;  %v1481_v6 = vld [vmem:[#allocation5 + $0x28] sm:$0xff]   ;;  %v1482_v7 = vld [vmem:[#allocation5 + $0x30] sm:$0xff]   ;;  %v1483_v8 = vld [vmem:[#allocation5 + $0x38] sm:$0xff]   ;;  %s1239_s8 = sshll.u32 %s1711_s5, 4  ;;  %s1240_s8 = int_to_ptr.vmem [resolvable:$true] %s1239_s8 }
  0x71   :  { %1423 = vmatpush3.bf16.msra.mxu0 %v1476_v1  ;;  %1443 = vmatpush3.bf16.msra.mxu1 %v1476_v1  ;;  %v1825_v9 = vld [vmem:[#allocation2] sm:$0xf]  ;;  %v254_v11 = vld [vmem:[#allocation7] sm:$0xff]  ;;  %v255_v13 = vld [vmem:[#allocation7 + $0x8] sm:$0xff]  ;;  %s1666_s14 = scalar_lea.vmem %s1240_s8, 64  ;;  %p1671_p7 = scmp.lt.s32.totalorder %s1240_s8, %s1240_s8 }
  0x72   :  { %1424 = vmatprep.subr.bf16.mxu0 %v1708_v0  ;;  %1444 = vmatprep.subr.bf16.mxu1 %v1708_v0  ;;  %v119_v10 = vpack.c.bf16 %v1825_v9, %v1825_v9  ;;  %v258_v12 = vld [vmem:[#allocation7 + $0x20] sm:$0xff]  ;;  %v259_v16 = vld [vmem:[#allocation7 + $0x28] sm:$0xff]  ;;  %p1667_p6 = scmp.ne.s32.totalorder %s1240_s8, %s1666_s14  ;;  %p1672_p8 = scmp.lt.s32.totalorder %s1666_s14, %s1666_s14 }
  0x73   :  { %v1259_v14 = vcombine.low %v254_v11, %v258_v12  ;;  %v1260_v15 = vcombine.high %v254_v11, %v258_v12  ;;  %v262_v17 = vld [vmem:[#allocation7 + $0x40] sm:$0xff]  ;;  %v1261_v19 = vcombine.low %v255_v13, %v259_v16  ;;  %v1262_v20 = vcombine.high %v255_v13, %v259_v16  ;;  %v263_v35 = vld [vmem:[#allocation7 + $0x48] sm:$0xff]  ;;  %v260_v16 = vld [vmem:[#allocation7 + $0x30] sm:$0xff] }
  0x74   :  { %v266_v18 = vld [vmem:[#allocation7 + $0x60] sm:$0xff]  ;;  %v267_v36 = vld [vmem:[#allocation7 + $0x68] sm:$0xff]  ;;  %p1673_p9 = por %p1672_p8, %p1671_p7 }
  0x75   :  { %1425 = vmatpush3.bf16.msra.mxu0 %v1477_v2  ;;  %1445 = vmatpush3.bf16.msra.mxu1 %v1477_v2  ;;  %v1268_v21 = vcombine.high %v262_v17, %v266_v18  ;;  %v1267_v22 = vcombine.low %v262_v17, %v266_v18  ;;  %v270_v23 = vld [vmem:[#allocation7 + $0x80] sm:$0xff]  ;;  %v1270_v40 = vcombine.high %v263_v35, %v267_v36  ;;  %v271_v41 = vld [vmem:[#allocation7 + $0x88] sm:$0xff]  ;;  %v257_v17 = vld [vmem:[#allocation7 + $0x18] sm:$0xff] }
  0x76   :  { %1426 = vmatprep.subr.bf16.mxu0 %v1708_v0  ;;  %1446 = vmatprep.subr.bf16.mxu1 %v1708_v0  ;;  %v274_v24 = vld [vmem:[#allocation7 + $0xa0] sm:$0xff]  ;;  %v275_v42 = vld [vmem:[#allocation7 + $0xa8] sm:$0xff]  ;;  %v1269_v43 = vcombine.low %v263_v35, %v267_v36  ;;  %v268_v36 = vld [vmem:[#allocation7 + $0x70] sm:$0xff]  ;;  %p1674_p10 = pnand %p1673_p9, %p1667_p6 }
  0x77   :  { %v1276_v25 = vcombine.high %v270_v23, %v274_v24  ;;  %v1275_v26 = vcombine.low %v270_v23, %v274_v24  ;;  %v278_v27 = vld [vmem:[#allocation7 + $0xc0] sm:$0xff]  ;;  %v1278_v44 = vcombine.high %v271_v41, %v275_v42  ;;  %v279_v45 = vld [vmem:[#allocation7 + $0xc8] sm:$0xff]  ;;  %v1277_v47 = vcombine.low %v271_v41, %v275_v42 }
  0x78   :  { %v282_v28 = vld [vmem:[#allocation7 + $0xe0] sm:$0xff]  ;;  %v283_v46 = vld [vmem:[#allocation7 + $0xe8] sm:$0xff] }
  0x79   :  { %1427 = vmatpush3.bf16.msra.mxu0 %v1478_v3  ;;  %1447 = vmatpush3.bf16.msra.mxu1 %v1478_v3  ;;  %v1284_v29 = vcombine.high %v278_v27, %v282_v28  ;;  %v1283_v30 = vcombine.low %v278_v27, %v282_v28  ;;  %v1286_v48 = vcombine.high %v279_v45, %v283_v46  ;;  %v286_v50 = vld [vmem:[#allocation7 + $0x100] sm:$0xff]  ;;  %v287_v52 = vld [vmem:[#allocation7 + $0x108] sm:$0xff] }
  0x7a   :  { %1428 = vmatprep.subr.bf16.mxu0 %v1708_v0  ;;  %1448 = vmatprep.subr.bf16.mxu1 %v1708_v0  ;;  %v1285_v49 = vcombine.low %v279_v45, %v283_v46  ;;  %v290_v51 = vld [vmem:[#allocation7 + $0x120] sm:$0xff]  ;;  %v291_v54 = vld [vmem:[#allocation7 + $0x128] sm:$0xff]  ;;  %v273_v45 = vld [vmem:[#allocation7 + $0x98] sm:$0xff] }
  0x7b   :  { %v1292_v53 = vcombine.high %v286_v50, %v290_v51  ;;  %v1291_v55 = vcombine.low %v286_v50, %v290_v51  ;;  %v1293_v56 = vcombine.low %v287_v52, %v291_v54  ;;  %v1294_v57 = vcombine.high %v287_v52, %v291_v54  ;;  %v294_v58 = vld [vmem:[#allocation7 + $0x140] sm:$0xff]  ;;  %v295_v60 = vld [vmem:[#allocation7 + $0x148] sm:$0xff]  ;;  %v277_v46 = vld [vmem:[#allocation7 + $0xb8] sm:$0xff] }
  0x7c   :  { %v298_v59 = vld [vmem:[#allocation7 + $0x160] sm:$0xff]  ;;  %v299_v63 = vld [vmem:[#allocation7 + $0x168] sm:$0xff]  ;;  %v280_v50 = vld [vmem:[#allocation7 + $0xd0] sm:$0xff] }
  0x7d   :  { %1429 = vmatpush3.bf16.msra.mxu0 %v1479_v4  ;;  %1449 = vmatpush3.bf16.msra.mxu1 %v1479_v4  ;;  %v1299_v61 = vcombine.low %v294_v58, %v298_v59  ;;  %v1300_v62 = vcombine.high %v294_v58, %v298_v59  ;;  %v306_v1 = vld [vmem:[#allocation7 + $0x1a0] sm:$0xff]  ;;  %v1301_v2 = vcombine.low %v295_v60, %v299_v63  ;;  %v311_v12 = vld [vmem:[#allocation7 + $0x1c8] sm:$0xff]  ;;  %v284_v51 = vld [vmem:[#allocation7 + $0xf0] sm:$0xff] }
  0x7e   :  { %1430 = vmatprep.subr.bf16.mxu0 %v1708_v0  ;;  %1450 = vmatprep.subr.bf16.mxu1 %v1708_v0  ;;  %v1302_v3 = vcombine.high %v295_v60, %v299_v63  ;;  %v314_v11 = vld [vmem:[#allocation7 + $0x1e0] sm:$0xff]  ;;  %v315_v13 = vld [vmem:[#allocation7 + $0x1e8] sm:$0xff]  ;;  %v281_v52 = vld [vmem:[#allocation7 + $0xd8] sm:$0xff] }
  0x7f   :  { %v288_v58 = vld [vmem:[#allocation7 + $0x110] sm:$0xff]  ;;  %v289_v60 = vld [vmem:[#allocation7 + $0x118] sm:$0xff] }
  0x80   :  { %v292_v59 = vld [vmem:[#allocation7 + $0x130] sm:$0xff] }
  0x81   :  { %1431 = vmatpush3.bf16.msra.mxu0 %v1480_v5  ;;  %1451 = vmatpush3.bf16.msra.mxu1 %v1480_v5  ;;  %v303_v5 = vld [vmem:[#allocation7 + $0x188] sm:$0xff] }
  0x82   :  { %1432 = vmatprep.subr.bf16.mxu0 %v1708_v0  ;;  %1452 = vmatprep.subr.bf16.mxu1 %v1708_v0 }
  0x85   :  { %1433 = vmatpush3.bf16.msra.mxu0 %v1481_v6  ;;  %1453 = vmatpush3.bf16.msra.mxu1 %v1481_v6  ;;  %v307_v6 = vld [vmem:[#allocation7 + $0x1a8] sm:$0xff] }
  0x86   :  { %1434 = vmatprep.subr.bf16.mxu0 %v1708_v0  ;;  %1454 = vmatprep.subr.bf16.mxu1 %v1708_v0  ;;  %v1309_v18 = vcombine.low %v303_v5, %v307_v6 }
  0x89   :  { %1435 = vmatpush3.bf16.msra.mxu0 %v1482_v7  ;;  %1455 = vmatpush3.bf16.msra.mxu1 %v1482_v7  ;;  %v310_v7 = vld [vmem:[#allocation7 + $0x1c0] sm:$0xff] }
  0x8a   :  { %1436 = vmatprep.subr.bf16.mxu0 %v1708_v0  ;;  %1456 = vmatprep.subr.bf16.mxu1 %v1708_v0  ;;  %v302_v0 = vld [vmem:[#allocation7 + $0x180] sm:$0xff]  ;;  %v1315_v24 = vcombine.low %v310_v7, %v314_v11 }
  0x8b   :  { %v1308_v4 = vcombine.high %v302_v0, %v306_v1 }
  0x8d   :  { %1437 = vmatpush3.bf16.msra.mxu0 %v1483_v8  ;;  %1457 = vmatpush3.bf16.msra.mxu1 %v1483_v8  ;;  %v1710_v8 = vmov 0  }
  0x8e   :  { %680 = vmatprep.subr.bf16.mxu0 %v1260_v15  ;;  %721 = vmatprep.subr.bf16.mxu1 %v1262_v20  ;;  %v256_v15 = vld [vmem:[#allocation7 + $0x10] sm:$0xff] }
  0x8f   :  { %v1263_v20 = vcombine.low %v256_v15, %v260_v16 }
  0x90   :  { %1439 = vmatmul.mubr.bf16.vlgmr.msra.gmra.mrb[0].mxu0 %v119_v10  ;;  %v1310_v10 = vcombine.high %v303_v5, %v307_v6  ;;  %v301_v5 = vld [vmem:[#allocation7 + $0x178] sm:$0xff]  ;;  %v1295_v6 = vcombine.low %v288_v58, %v292_v59 }
  0x91   :  { %681 = vmatpush1.bf16.msra.mxu0 %v1259_v14  ;;  %712 = vmatprep.mubr.bf16.mxu0 %v1710_v8  ;;  %v1307_v14 = vcombine.low %v302_v0, %v306_v1  ;;  %v1296_v0 = vcombine.high %v288_v58, %v292_v59  ;;  %v1513_v58 = vld [vmem:[#allocation10 + $0xf8] sm:$0xff]  }
  0x92   :  { %682 = vmatprep.subr.bf16.mxu0 %v1268_v21  ;;  %v261_v21 = vld [vmem:[#allocation7 + $0x38] sm:$0xff]  ;;  %v1514_v59 = vld [vmem:[#allocation10 + $0x38] sm:$0xff]  }
  0x93   :  { %v1265_v23 = vcombine.low %v257_v17, %v261_v21  ;;  %v1266_v27 = vcombine.high %v257_v17, %v261_v21  ;;  %v313_v21 = vld [vmem:[#allocation7 + $0x1d8] sm:$0xff] }
  0x95   :  { %683 = vmatpush1.bf16.msra.mxu0 %v1267_v22  ;;  %v1318_v22 = vcombine.high %v311_v12, %v315_v13 }
  0x96   :  { %684 = vmatprep.subr.bf16.mxu0 %v1276_v25  ;;  %v1317_v25 = vcombine.low %v311_v12, %v315_v13  ;;  %v308_v12 = vld [vmem:[#allocation7 + $0x1b0] sm:$0xff]  ;;  %v305_v13 = vld [vmem:[#allocation7 + $0x198] sm:$0xff] }
  0x99   :  { %685 = vmatpush1.bf16.msra.mxu0 %v1275_v26  ;;  %v1264_v26 = vcombine.high %v256_v15, %v260_v16 }
  0x9a   :  { %686 = vmatprep.subr.bf16.mxu0 %v1284_v29 }
  0x9d   :  { %687 = vmatpush1.bf16.msra.mxu0 %v1283_v30 }
  0x9e   :  { %688 = vmatprep.subr.bf16.mxu0 %v1292_v53  ;;  %v285_v53 = vld [vmem:[#allocation7 + $0xf8] sm:$0xff] }
  0x9f   :  { %v1289_v63 = vcombine.low %v281_v52, %v285_v53 }
  0xa1   :  { %689 = vmatpush1.bf16.msra.mxu0 %v1291_v55  ;;  %v1281_v55 = vcombine.low %v273_v45, %v277_v46 }
  0xa2   :  { %690 = vmatprep.subr.bf16.mxu0 %v1300_v62  ;;  %v1287_v62 = vcombine.low %v280_v50, %v284_v51 }
  0xa5   :  { %691 = vmatpush1.bf16.msra.mxu0 %v1299_v61  ;;  %v293_v61 = vld [vmem:[#allocation7 + $0x138] sm:$0xff] }
  0xa6   :  { %692 = vmatprep.subr.bf16.mxu0 %v1308_v4  ;;  %v1298_v1 = vcombine.high %v289_v60, %v293_v61  ;;  %v297_v4 = vld [vmem:[#allocation7 + $0x158] sm:$0xff] }
  0xa7   :  { %v1305_v16 = vcombine.low %v297_v4, %v301_v5 }
  0xa9   :  { %693 = vmatpush1.bf16.msra.mxu0 %v1307_v14  ;;  %v309_v14 = vld [vmem:[#allocation7 + $0x1b8] sm:$0xff] }
 0x163   :  { %v202_v31 = vpop.f32.mrb[0].mxu0 }
 0x164   :  { %v1830_v32 = vsub.f32 %v1825_v9, %v202_v31  ;;  %v1440_v33 = vpop.f32.mrb[1].mxu0 }
 0x165   :  { %v205_v34 = vpop.f32.mrb[2].mxu0 }
 0x166   :  { %v209_v37 = vmul.f32 %v1830_v32, %v1830_v32  ;;  %v1441_v38 = vpop.f32.mrb[3].mxu0  ;;  %v264_v34 = vld [vmem:[#allocation7 + $0x50] sm:$0xff] }
 0x167   :  { %v269_v38 = vld [vmem:[#allocation7 + $0x78] sm:$0xff]  ;;  %v1272_v41 = vcombine.high %v264_v34, %v268_v36 }
 0x168   :  { %v210_v39 = vpack.c.bf16 %v209_v37, %v209_v37  ;;  %v265_v37 = vld [vmem:[#allocation7 + $0x58] sm:$0xff] }
 0x169   :  { %v1274_v42 = vcombine.high %v265_v37, %v269_v38 }
 0x16a   :  { %1459 = vmatmul.mubr.bf16.vlgmr.msra.gmra.mrb[0].mxu1 %v210_v39 }
 0x16b   :  { %722 = vmatpush1.bf16.msra.mxu1 %v1261_v19  ;;  %753 = vmatprep.mubr.bf16.mxu1 %v1710_v8  ;;  %v1316_v19 = vcombine.high %v310_v7, %v314_v11  ;;  %v1297_v7 = vcombine.low %v289_v60, %v293_v61  ;;  %v304_v11 = vld [vmem:[#allocation7 + $0x190] sm:$0xff]  ;;  %v1515_v60 = vld [vmem:[#allocation10 + $0xb8] sm:$0xff]   ;;  %v320_v61 = vlaneseq }
 0x16c   :  { %723 = vmatprep.subr.bf16.mxu1 %v1270_v40  ;;  %v1312_v17 = vcombine.high %v304_v11, %v308_v12 }
 0x16d   :  { %694 = vmatprep.subr.bf16.mxu0 %v1316_v19  ;;  %v312_v19 = vld [vmem:[#allocation7 + $0x1d0] sm:$0xff] }
 0x16e   :  { %695 = vmatpush1.bf16.msra.mxu0 %v1315_v24  ;;  %v1313_v24 = vcombine.low %v305_v13, %v309_v14 }
 0x16f   :  { %724 = vmatpush1.bf16.msra.mxu1 %v1269_v43  ;;  %762 = vmatprep.subr.bf16.mxu0 %v1264_v26  ;;  %v272_v43 = vld [vmem:[#allocation7 + $0x90] sm:$0xff] }
 0x170   :  { %725 = vmatprep.subr.bf16.mxu1 %v1278_v44  ;;  %v276_v44 = vld [vmem:[#allocation7 + $0xb0] sm:$0xff] }
 0x171   :  { %v1279_v54 = vcombine.low %v272_v43, %v276_v44 }
 0x173   :  { %726 = vmatpush1.bf16.msra.mxu1 %v1277_v47  ;;  %v1271_v47 = vcombine.low %v264_v34, %v268_v36  ;;  %v1488_v34 = vld [vmem:[#allocation10 + $0x48] sm:$0xff]  }
 0x174   :  { %727 = vmatprep.subr.bf16.mxu1 %v1286_v48  ;;  %v1273_v48 = vcombine.low %v265_v37, %v269_v38  ;;  %v1490_v36 = vld [vmem:[#allocation10 + $0x8] sm:$0xff]   ;;  %v1492_v38 = vld [vmem:[#allocation10 + $0x50] sm:$0xff]  }
 0x175   :  { %v1491_v37 = vld [vmem:[#allocation10 + $0x88] sm:$0xff]  }
 0x177   :  { %728 = vmatpush1.bf16.msra.mxu1 %v1285_v49  ;;  %v1280_v49 = vcombine.high %v272_v43, %v276_v44  ;;  %v1497_v43 = vld [vmem:[#allocation10 + $0xd8] sm:$0xff]  }
 0x178   :  { %729 = vmatprep.subr.bf16.mxu1 %v1294_v57  ;;  %v1290_v57 = vcombine.high %v281_v52, %v285_v53  ;;  %v1498_v44 = vld [vmem:[#allocation10 + $0x18] sm:$0xff]   ;;  %v1507_v52 = vld [vmem:[#allocation10 + $0xa8] sm:$0xff]   ;;  %v1508_v53 = vld [vmem:[#allocation10 + $0x70] sm:$0xff]  }
 0x17b   :  { %730 = vmatpush1.bf16.msra.mxu1 %v1293_v56  ;;  %v1288_v56 = vcombine.high %v280_v50, %v284_v51  ;;  %v1505_v50 = vld [vmem:[#allocation10 + $0xe8] sm:$0xff]  }
 0x17c   :  { %731 = vmatprep.subr.bf16.mxu1 %v1302_v3  ;;  %v300_v3 = vld [vmem:[#allocation7 + $0x170] sm:$0xff] }
 0x17d   :  { %v1506_v51 = vld [vmem:[#allocation10 + $0x28] sm:$0xff]  }
 0x17f   :  { %732 = vmatpush1.bf16.msra.mxu1 %v1301_v2  ;;  %v296_v2 = vld [vmem:[#allocation7 + $0x150] sm:$0xff] }
 0x180   :  { %733 = vmatprep.subr.bf16.mxu1 %v1310_v10  ;;  %v1306_v10 = vcombine.high %v297_v4, %v301_v5  ;;  %v1303_v15 = vcombine.low %v296_v2, %v300_v3 }
 0x183   :  { %734 = vmatpush1.bf16.msra.mxu1 %v1309_v18  ;;  %v1314_v18 = vcombine.high %v305_v13, %v309_v14 }
 0x184   :  { %735 = vmatprep.subr.bf16.mxu1 %v1318_v22  ;;  %v317_v22 = vld [vmem:[#allocation7 + $0x1f8] sm:$0xff] }
 0x185   :  { %v1322_v26 = vcombine.high %v313_v21, %v317_v22 }
 0x187   :  { %736 = vmatpush1.bf16.msra.mxu1 %v1317_v25 }
 0x188   :  { %803 = vmatprep.subr.bf16.mxu1 %v1266_v27 }
 0x23d   :  { %v245_v28 = vpop.f32.mrb[0].mxu1 }
 0x23e   :  { %v246_v29 = vadd.f32 1e-05, %v245_v28  ;;  %v1460_v30 = vpop.f32.mrb[1].mxu1  ;;  %v1321_v28 = vcombine.low %v313_v21, %v317_v22 }
 0x23f   :  { %v248_v31 = vpop.f32.mrb[2].mxu1  ;;  %v1485_v30 = vld [vmem:[#allocation10 + $0xc0] sm:$0xff]  }
 0x240   :  { %1516 = vrsqrt.f32 %v246_v29  ;;  %v1461_v33 = vpop.f32.mrb[3].mxu1  ;;  %v1484_v29 = vld [vmem:[#allocation10 + $0x40] sm:$0xff]  }
 0x241   :  { %v1486_v31 = vld [vmem:[#allocation10] sm:$0xff]  }
 0x242   :  { %v1487_v33 = vld [vmem:[#allocation10 + $0x80] sm:$0xff]  }
 0x24a   :  { %v1517_v35 = vpop.eup %1516 }
 0x24b   :  { %v252_v39 = vmul.f32 %v1517_v35, %v1830_v32  ;;  %v1282_v32 = vcombine.high %v273_v45, %v277_v46  ;;  %v1489_v35 = vld [vmem:[#allocation10 + $0xc8] sm:$0xff]   ;;  %v1499_v45 = vld [vmem:[#allocation10 + $0x98] sm:$0xff]   ;;  %v1500_v46 = vld [vmem:[#allocation10 + $0x60] sm:$0xff]  }
 0x24d   :  { %v1837_v40 = vpack.c.bf16 %v252_v39, %v252_v39  ;;  %v1493_v39 = vld [vmem:[#allocation10 + $0xd0] sm:$0xff]  }
 0x24f   :  { %713 = vmatmul.mubr.bf16.vlgmr.msra.gmra.mrb[4].mxu0 %v1837_v40  ;;  %754 = vmatmul.mubr.bf16.vlgmr.msra.gmra.mrb[4].mxu1 %v1837_v40 }
 0x250   :  { %763 = vmatpush1.bf16.msra.mxu0 %v1263_v20  ;;  %804 = vmatpush1.bf16.msra.mxu1 %v1265_v23  ;;  %v316_v20 = vld [vmem:[#allocation7 + $0x1f0] sm:$0xff]  ;;  %v1311_v23 = vcombine.low %v304_v11, %v308_v12 }
 0x251   :  { %764 = vmatprep.subr.bf16.mxu0 %v1272_v41  ;;  %805 = vmatprep.subr.bf16.mxu1 %v1274_v42  ;;  %v1320_v25 = vcombine.high %v312_v19, %v316_v20  ;;  %v1319_v27 = vcombine.low %v312_v19, %v316_v20  ;;  %v1494_v41 = vld [vmem:[#allocation10 + $0x10] sm:$0xff]   ;;  %v1496_v42 = vld [vmem:[#allocation10 + $0x58] sm:$0xff]  }
 0x252   :  { %794 = vmatprep.mubr.bf16.mxu0 %v1710_v8  ;;  %835 = vmatprep.mubr.bf16.mxu1 %v1710_v8  ;;  %v1304_v8 = vcombine.high %v296_v2, %v300_v3 }
 0x254   :  { %765 = vmatpush1.bf16.msra.mxu0 %v1271_v47  ;;  %806 = vmatpush1.bf16.msra.mxu1 %v1273_v48  ;;  %v1501_v47 = vld [vmem:[#allocation10 + $0xe0] sm:$0xff]  }
 0x255   :  { %766 = vmatprep.subr.bf16.mxu0 %v1280_v49  ;;  %807 = vmatprep.subr.bf16.mxu1 %v1282_v32  ;;  %v1502_v48 = vld [vmem:[#allocation10 + $0x20] sm:$0xff]   ;;  %v1504_v32 = vld [vmem:[#allocation10 + $0x68] sm:$0xff]  }
 0x256   :  { %v1503_v49 = vld [vmem:[#allocation10 + $0xa0] sm:$0xff]  }
 0x258   :  { %767 = vmatpush1.bf16.msra.mxu0 %v1279_v54  ;;  %808 = vmatpush1.bf16.msra.mxu1 %v1281_v55  ;;  %v1509_v54 = vld [vmem:[#allocation10 + $0xf0] sm:$0xff]  }
 0x259   :  { %768 = vmatprep.subr.bf16.mxu0 %v1288_v56  ;;  %809 = vmatprep.subr.bf16.mxu1 %v1290_v57  ;;  %v1510_v55 = vld [vmem:[#allocation10 + $0x30] sm:$0xff]   ;;  %v1512_v57 = vld [vmem:[#allocation10 + $0x78] sm:$0xff]  }
 0x25a   :  { %v1511_v56 = vld [vmem:[#allocation10 + $0xb0] sm:$0xff]  }
 0x25c   :  { %769 = vmatpush1.bf16.msra.mxu0 %v1287_v62  ;;  %810 = vmatpush1.bf16.msra.mxu1 %v1289_v63  ;;  %v321_v62 = vshrl.u32 %v320_v61, 7 }
 0x25d   :  { %770 = vmatprep.subr.bf16.mxu0 %v1296_v0  ;;  %811 = vmatprep.subr.bf16.mxu1 %v1298_v1  ;;  %v318_v1 = vld [vmem:[#allocation8] sm:$0xff] }
 0x25e   :  { %v322_v63 = vsub.s32 0, %v321_v62  ;;  %v330_v0 = vsub.s32 2, %v321_v62  ;;  %v326_v2 = vsub.s32 1, %v321_v62  ;;  %v334_v3 = vsub.s32 3, %v321_v62 }
 0x260   :  { %771 = vmatpush1.bf16.msra.mxu0 %v1295_v6  ;;  %812 = vmatpush1.bf16.msra.mxu1 %v1297_v7  ;;  %v323_v4 = vrot.slane %v318_v1, %v322_v63  ;;  %v331_v5 = vrot.slane %v318_v1, %v330_v0  ;;  %v327_v6 = vrot.slane %v318_v1, %v326_v2 }
 0x261   :  { %772 = vmatprep.subr.bf16.mxu0 %v1304_v8  ;;  %813 = vmatprep.subr.bf16.mxu1 %v1306_v10  ;;  %v335_v7 = vrot.slane %v318_v1, %v334_v3 }
 0x264   :  { %773 = vmatpush1.bf16.msra.mxu0 %v1303_v15  ;;  %814 = vmatpush1.bf16.msra.mxu1 %v1305_v16 }
 0x265   :  { %774 = vmatprep.subr.bf16.mxu0 %v1312_v17  ;;  %815 = vmatprep.subr.bf16.mxu1 %v1314_v18 }
 0x268   :  { %775 = vmatpush1.bf16.msra.mxu0 %v1311_v23  ;;  %816 = vmatpush1.bf16.msra.mxu1 %v1313_v24 }
 0x269   :  { %776 = vmatprep.subr.bf16.mxu0 %v1320_v25  ;;  %817 = vmatprep.subr.bf16.mxu1 %v1322_v26 }
 0x26c   :  { %777 = vmatpush1.bf16.msra.mxu0 %v1319_v27  ;;  %818 = vmatpush1.bf16.msra.mxu1 %v1321_v28 }
 0x26d   :  { %1378 = vmatprep.subr.bf16.mxu0 %v1484_v29  ;;  %1400 = vmatprep.subr.bf16.mxu1 %v1485_v30 }
 0x26f   :  { %795 = vmatmul.mubr.bf16.vlgmr.msra.gmra.mrb[8].mxu0 %v1837_v40  ;;  %836 = vmatmul.mubr.bf16.vlgmr.msra.gmra.mrb[8].mxu1 %v1837_v40  ;;  %v1495_v40 = vld [vmem:[#allocation10 + $0x90] sm:$0xff]  }
 0x270   :  { %1379 = vmatpush3.bf16.msra.mxu0 %v1486_v31  ;;  %1401 = vmatpush3.bf16.msra.mxu1 %v1487_v33 }
 0x271   :  { %1380 = vmatprep.subr.bf16.mxu0 %v1488_v34  ;;  %1402 = vmatprep.subr.bf16.mxu1 %v1489_v35 }
 0x274   :  { %1381 = vmatpush3.bf16.msra.mxu0 %v1490_v36  ;;  %1403 = vmatpush3.bf16.msra.mxu1 %v1491_v37 }
 0x275   :  { %1382 = vmatprep.subr.bf16.mxu0 %v1492_v38  ;;  %1404 = vmatprep.subr.bf16.mxu1 %v1493_v39  ;;  %v338_v38 = vsub.s32 4, %v321_v62  ;;  %v346_v39 = vsub.s32 6, %v321_v62 }
 0x278   :  { %1383 = vmatpush3.bf16.msra.mxu0 %v1494_v41  ;;  %1405 = vmatpush3.bf16.msra.mxu1 %v1495_v40  ;;  %v342_v41 = vsub.s32 5, %v321_v62  ;;  %v350_v40 = vsub.s32 7, %v321_v62 }
 0x279   :  { %1384 = vmatprep.subr.bf16.mxu0 %v1496_v42  ;;  %1406 = vmatprep.subr.bf16.mxu1 %v1497_v43  ;;  %v339_v42 = vrot.slane %v318_v1, %v338_v38  ;;  %v347_v43 = vrot.slane %v318_v1, %v346_v39 }
 0x27c   :  { %1385 = vmatpush3.bf16.msra.mxu0 %v1498_v44  ;;  %1407 = vmatpush3.bf16.msra.mxu1 %v1499_v45  ;;  %v343_v44 = vrot.slane %v318_v1, %v342_v41  ;;  %v351_v45 = vrot.slane %v318_v1, %v350_v40 }
 0x27d   :  { %1386 = vmatprep.subr.bf16.mxu0 %v1500_v46  ;;  %1408 = vmatprep.subr.bf16.mxu1 %v1501_v47 }
 0x280   :  { %1387 = vmatpush3.bf16.msra.mxu0 %v1502_v48  ;;  %1409 = vmatpush3.bf16.msra.mxu1 %v1503_v49 }
 0x281   :  { %1388 = vmatprep.subr.bf16.mxu0 %v1504_v32  ;;  %1410 = vmatprep.subr.bf16.mxu1 %v1505_v50 }
 0x284   :  { %1389 = vmatpush3.bf16.msra.mxu0 %v1506_v51  ;;  %1411 = vmatpush3.bf16.msra.mxu1 %v1507_v52 }
 0x285   :  { %1390 = vmatprep.subr.bf16.mxu0 %v1508_v53  ;;  %1412 = vmatprep.subr.bf16.mxu1 %v1509_v54 }
 0x288   :  { %1391 = vmatpush3.bf16.msra.mxu0 %v1510_v55  ;;  %1413 = vmatpush3.bf16.msra.mxu1 %v1511_v56 }
 0x289   :  { %1392 = vmatprep.subr.bf16.mxu0 %v1512_v57  ;;  %1414 = vmatprep.subr.bf16.mxu1 %v1513_v58 }
 0x28c   :  { %1393 = vmatpush3.bf16.msra.mxu0 %v1514_v59  ;;  %1415 = vmatpush3.bf16.msra.mxu1 %v1515_v60 }
 0x322   :  { %v714_v8 = vpop.f32.mrb[4].mxu0  ;;  %v755_v10 = vpop.f32.mrb[4].mxu1 }
 0x323   :  { %v715_v11 = vadd.f32 %v714_v8, %v323_v4  ;;  %v756_v12 = vadd.f32 %v755_v10, %v331_v5  ;;  %v716_v13 = vpop.f32.mrb[5].mxu0  ;;  %v757_v14 = vpop.f32.mrb[5].mxu1 }
 0x324   :  { %v717_v15 = vadd.f32 %v716_v13, %v327_v6  ;;  %v758_v16 = vadd.f32 %v757_v14, %v335_v7  ;;  %v718_v17 = vpop.f32.mrb[6].mxu0  ;;  %v759_v18 = vpop.f32.mrb[6].mxu1 }
 0x325   :  { %v844_v19 = vpack.c.bf16 %v715_v11, %v715_v11  ;;  %v846_v20 = vpack.c.bf16 %v756_v12, %v756_v12  ;;  %v719_v21 = vpop.f32.mrb[7].mxu0  ;;  %v760_v22 = vpop.f32.mrb[7].mxu1 }
 0x326   :  { %v845_v23 = vpack.c.bf16 %v717_v15, %v717_v15  ;;  %v847_v24 = vpack.c.bf16 %v758_v16, %v758_v16  ;;  %v1327_v16 = vld [vmem:[#allocation11] ss:$0 sm:$0xff] }
 0x327   :  { %v1323_v25 = vmul.bf16 3216621497, %v844_v19  ;;  %v1325_v26 = vmul.bf16 3216621497, %v846_v20 }
 0x328   :  { %v1324_v27 = vmul.bf16 3216621497, %v845_v23  ;;  %v1326_v28 = vmul.bf16 3216621497, %v847_v24 }
 0x329   :  { %1518 = vpow.bf16 %v1323_v25 }
 0x32a   :  { %1520 = vpow.bf16 %v1325_v26 }
 0x32b   :  { %1522 = vpow.bf16 %v1324_v27 }
 0x32c   :  { %1524 = vpow.bf16 %v1326_v28 }
 0x334   :  { %v1519_v29 = vpop.eup %1518 }
 0x335   :  { %v1521_v30 = vpop.eup %1520  ;;  %v868_v31 = vadd.bf16 1065369472, %v1519_v29 }
 0x336   :  { %v1523_v33 = vpop.eup %1522  ;;  %v870_v34 = vadd.bf16 1065369472, %v1521_v30 }
 0x337   :  { %v1525_v35 = vpop.eup %1524  ;;  %1526 = vrcp.bf16 %v868_v31  ;;  %v869_v36 = vadd.bf16 1065369472, %v1523_v33 }
 0x338   :  { %1528 = vrcp.bf16 %v870_v34  ;;  %v871_v37 = vadd.bf16 1065369472, %v1525_v35 }
 0x339   :  { %1530 = vrcp.bf16 %v869_v36 }
 0x33a   :  { %1532 = vrcp.bf16 %v871_v37 }
 0x342   :  { %v1527_v46 = vpop.eup %1526  ;;  %v796_v47 = vpop.f32.mrb[8].mxu0 }
 0x343   :  { %v837_v48 = vpop.f32.mrb[8].mxu1  ;;  %v1529_v49 = vpop.eup %1528  ;;  %v873_v32 = vmul.bf16 1065369472, %v1527_v46  ;;  %v797_v50 = vadd.f32 %v796_v47, %v339_v42 }
 0x344   :  { %v838_v51 = vadd.f32 %v837_v48, %v347_v43  ;;  %v798_v52 = vpop.f32.mrb[9].mxu0  ;;  %v839_v53 = vpop.f32.mrb[9].mxu1  ;;  %v877_v55 = vmul.bf16 1065369472, %v1529_v49 }
 0x345   :  { %v1531_v54 = vpop.eup %1530  ;;  %v799_v56 = vadd.f32 %v798_v52, %v343_v44  ;;  %v840_v57 = vadd.f32 %v839_v53, %v351_v45  ;;  %v800_v58 = vpop.f32.mrb[10].mxu0  ;;  %v880_v61 = vmul.bf16 %v873_v32, %v844_v19  ;;  %v848_v63 = vpack.c.bf16 %v797_v50, %v797_v50 }
 0x346   :  { %v841_v59 = vpop.f32.mrb[10].mxu1  ;;  %v1533_v60 = vpop.eup %1532  ;;  %v875_v62 = vmul.bf16 1065369472, %v1531_v54  ;;  %v850_v0 = vpack.c.bf16 %v838_v51, %v838_v51  ;;  %v882_v3 = vmul.bf16 %v877_v55, %v846_v20 }
 0x347   :  { %v801_v1 = vpop.f32.mrb[11].mxu0  ;;  %v842_v2 = vpop.f32.mrb[11].mxu1  ;;  %v879_v4 = vmul.bf16 1065369472, %v1533_v60  ;;  %v849_v5 = vpack.c.bf16 %v799_v56, %v799_v56  ;;  %v851_v6 = vpack.c.bf16 %v840_v57, %v840_v57  ;;  %v884_v8 = vmul.bf16 %v880_v61, %v848_v63 }
 0x348   :  { %v881_v7 = vmul.bf16 %v875_v62, %v845_v23  ;;  %v886_v11 = vmul.bf16 %v882_v3, %v850_v0 }
 0x349   :  { %v883_v10 = vmul.bf16 %v879_v4, %v847_v24 }
 0x34a   :  { %v885_v12 = vmul.bf16 %v881_v7, %v849_v5 }
 0x34b   :  { %v887_v13 = vmul.bf16 %v883_v10, %v851_v6 }
 0x34c   :  { %1183 = vmatprep.mubr.bf16.mxu0 %v885_v12 }
 0x34d   :  { %1223 = vmatprep.mubr.bf16.mxu1 %v887_v13  ;;  %1184 = vmatmul.mubr.bf16.vlgmr.msra.gmra.mrb[12].mxu0 %v884_v8 }
 0x34e   :  { %1224 = vmatmul.mubr.bf16.vlgmr.msra.gmra.mrb[12].mxu1 %v886_v11 }
 0x420   :  { %v1394_v14 = vpop.f32.mrb[12].mxu0 }
 0x421   :  { %v1416_v15 = vpop.f32.mrb[12].mxu1  ;;  %v1395_v17 = vpop.f32.mrb[13].mxu0 }
 0x422   :  { %v1396_v18 = vadd.f32 %v1395_v17, %v1394_v14  ;;  %v1417_v19 = vpop.f32.mrb[13].mxu1  ;;  %v1397_v20 = vpop.f32.mrb[14].mxu0 }
 0x423   :  { %v1418_v21 = vadd.f32 %v1417_v19, %v1416_v15  ;;  %v1419_v22 = vpop.f32.mrb[14].mxu1  ;;  %v1398_v25 = vpop.f32.mrb[15].mxu0 }
 0x424   :  { %v1186_v23 = vadd.f32 %v1396_v18, %v1327_v16  ;;  %v1420_v26 = vpop.f32.mrb[15].mxu1 }
 0x426   :  { %v1226_v24 = vadd.f32 %v1418_v21, %v1186_v23 }
 0x428   :  { %v1231_v27 = vadd.f32 %v1226_v24, %v1825_v9 }
 0x42a   :  { %1232 = vst [vmem:[#allocation13] sm:$0xf] %v1231_v27 }
 0x42b   :  { %1677 = shalt.err (!%p1674_p10)
}
 0x42c   :  { %s1678_s23 = scalar_lea.hbm %s1864_s6, 64 }
 0x42d   :  { %p1679_p11 = scmp.ne.s32.totalorder %s1864_s6, %s1678_s23  ;;  %p1682_p12 = scmp.lt.u32.totalorder %s1678_s23, %s1864_s6 }
 0x42f   :  { %p1684_p13 = pnand %p1682_p12, %p1679_p11 }
 0x431   :  { %1687 = shalt.err (!%p1684_p13)
}
 0x432   :  { %1242 = dma.vmem_to_hbm [thread:$0]  %s1240_s8, 64, %s1864_s6, [#allocation4]  }
 0x433   :  { %1696 = dma.done.wait [#allocation4], 64  }
 0x434   :  { %1697 = vsyncadd [#allocation4], 4294967232 }
 0x435   :  { %1246 = vsyncpa [#allocation3], 1 }
 0x436   :  { %1247 = vsyncpa [#allocation6], 1 }
 0x437   :  { %1248 = vsyncpa [#allocation9], 1 }
 0x438   :  { %1249 = vsyncpa [#allocation12], 1 }
 0x439   :  { %1250 = vsyncpa [#allocation4], 1 }

</bundles_post_ra>
